<compile_context>
chip_gen: v7x
topology: tpu7x:2x2x1
jax: 0.10.0
libtpu: 0.0.40
codegen_flags: <defaults>
</compile_context>

<pallas_src>
import functools
import math

import jax
import jax.numpy as jnp
from jax.experimental import pallas as pl
from jax.experimental.pallas import tpu as pltpu


def _vmem_limit_bytes():
    """3/4 of physical VMEM, capped at 100 MB (v5e/v6e ~96 MiB, v7x 48 MiB)."""
    try:
        cap = int(pltpu.get_tpu_info().vmem_capacity_bytes)
    except Exception:
        cap = 64 * 1024 * 1024
    return int(min(100 * 1024 * 1024, (cap * 3) // 4))


VMEM_LIMIT = _vmem_limit_bytes()


def _tile(dim, target, align):
    """Largest tile <= target that divides `dim` and is a multiple of `align`
    (or the full dim if dim <= target / no aligned divisor exists)."""
    if dim <= target:
        return dim
    t = (target // align) * align
    while t >= align:
        if dim % t == 0:
            return t
        t -= align
    return dim


def _head_group(n_heads, head_dim):
    """Smallest divisor G of n_heads with G*head_dim % 128 == 0, else n_heads."""
    for g in range(1, n_heads + 1):
        if n_heads % g == 0 and (g * head_dim) % 128 == 0:
            return g
    return n_heads


# ----------------------------------------------------------------------------
# Tiled GEMM (+ bias, + optional ReLU) -- FFN.w1 / cross-attn Q projection
# ----------------------------------------------------------------------------

def _linear_kernel(x_ref, w_ref, b_ref, o_ref, acc_ref, *, activation):
    k = pl.program_id(2)

    @pl.when(k == 0)
    def _():
        acc_ref[...] = jnp.zeros_like(acc_ref)

    acc_ref[...] += jnp.dot(x_ref[...], w_ref[...],
                            preferred_element_type=jnp.float32)

    @pl.when(k == pl.num_programs(2) - 1)
    def _():
        y = acc_ref[...] + b_ref[...]                      # f32
        if activation == "relu":
            y = jnp.maximum(y, 0.0)
        o_ref[...] = y.astype(o_ref.dtype)


def linear(x, w, b, activation=None, out_dtype=jnp.bfloat16,
           tm_t=256, tn_t=1024, tk_t=1024):
    M, K = x.shape
    _, N = w.shape
    tm = _tile(M, tm_t, 8)
    tn = _tile(N, tn_t, 128)
    tk = _tile(K, tk_t, 128)
    grid = (M // tm, N // tn, K // tk)
    cost = pl.CostEstimate(
        flops=2 * M * N * K,
        transcendentals=0,
        bytes_accessed=int(M * K * x.dtype.itemsize + K * N * w.dtype.itemsize
                           + M * N * jnp.dtype(out_dtype).itemsize))
    return pl.pallas_call(
        functools.partial(_linear_kernel, activation=activation),
        out_shape=jax.ShapeDtypeStruct((M, N), out_dtype),
        grid=grid,
        in_specs=[pl.BlockSpec((tm, tk), lambda i, j, k: (i, k)),
                  pl.BlockSpec((tk, tn), lambda i, j, k: (k, j)),
                  pl.BlockSpec((1, tn), lambda i, j, k: (0, j))],
        out_specs=pl.BlockSpec((tm, tn), lambda i, j, k: (i, j)),
        scratch_shapes=[pltpu.VMEM((tm, tn), jnp.float32)],
        compiler_params=pltpu.CompilerParams(
            dimension_semantics=("parallel", "parallel", "arbitrary"),
            vmem_limit_bytes=VMEM_LIMIT),
        cost_estimate=cost,
    )(x, w, b.reshape(1, N))


# ----------------------------------------------------------------------------
# Fused multi-output projection: read the activation tile once, multiply it
# against several weight matrices (Q|K|V or K|V), one f32 accumulator each.
# Outputs are SEPARATE arrays, so attention never DMAs unused fused columns.
# ----------------------------------------------------------------------------

def _multi_linear_kernel(*args, n_out):
    x_ref = args[0]
    w_refs = args[1:1 + n_out]
    b_refs = args[1 + n_out:1 + 2 * n_out]
    o_refs = args[1 + 2 * n_out:1 + 3 * n_out]
    acc_refs = args[1 + 3 * n_out:]
    k = pl.program_id(1)

    @pl.when(k == 0)
    def _():
        for acc in acc_refs:
            acc[...] = jnp.zeros_like(acc)

    x = x_ref[...]                                          # bf16, read once
    for w_r, acc in zip(w_refs, acc_refs):
        acc[...] += jnp.dot(x, w_r[...], preferred_element_type=jnp.float32)

    @pl.when(k == pl.num_programs(1) - 1)
    def _():
        for o_r, acc, b_r in zip(o_refs, acc_refs, b_refs):
            o_r[...] = (acc[...] + b_r[...]).astype(o_r.dtype)


def multi_linear(x, ws, bs, out_dtype=jnp.bfloat16, tm_t=256, tk_t=1024):
    M, K = x.shape
    ns = [w.shape[1] for w in ws]
    n_out = len(ws)
    tm = _tile(M, tm_t, 8)
    tk = _tile(K, tk_t, 128)
    grid = (M // tm, K // tk)

    in_specs = [pl.BlockSpec((tm, tk), lambda i, k: (i, k))]
    in_specs += [pl.BlockSpec((tk, n), lambda i, k: (k, 0)) for n in ns]
    in_specs += [pl.BlockSpec((1, n), lambda i, k: (0, 0)) for n in ns]
    out_specs = [pl.BlockSpec((tm, n), lambda i, k: (i, 0)) for n in ns]
    out_shape = [jax.ShapeDtypeStruct((M, n), out_dtype) for n in ns]
    scratch = [pltpu.VMEM((tm, n), jnp.float32) for n in ns]

    cost = pl.CostEstimate(
        flops=2 * M * K * sum(ns),
        transcendentals=0,
        bytes_accessed=int(M * K * x.dtype.itemsize
                           + sum(K * n for n in ns) * 2
                           + sum(M * n for n in ns) * jnp.dtype(out_dtype).itemsize))
    outs = pl.pallas_call(
        functools.partial(_multi_linear_kernel, n_out=n_out),
        out_shape=out_shape,
        grid=grid,
        in_specs=in_specs,
        out_specs=out_specs,
        scratch_shapes=scratch,
        compiler_params=pltpu.CompilerParams(
            dimension_semantics=("parallel", "arbitrary"),
            vmem_limit_bytes=VMEM_LIMIT),
        cost_estimate=cost,
    )(x, *ws, *[b.reshape(1, -1) for b in bs])
    return tuple(outs) if isinstance(outs, (list, tuple)) else (outs,)


# ----------------------------------------------------------------------------
# Fused tiled GEMM + bias + residual add + LayerNorm epilogue
#   out = LN(res + x @ w + b) * gamma + beta     (LN over the full hidden axis)
# ----------------------------------------------------------------------------

def _linear_res_ln_kernel(x_ref, w_ref, b_ref, r_ref, g_ref, bb_ref,
                          o_ref, acc_ref, *, eps):
    k = pl.program_id(1)

    @pl.when(k == 0)
    def _():
        acc_ref[...] = jnp.zeros_like(acc_ref)

    acc_ref[...] += jnp.dot(x_ref[...], w_ref[...],
                            preferred_element_type=jnp.float32)

    @pl.when(k == pl.num_programs(1) - 1)
    def _():
        y = acc_ref[...] + b_ref[...] + r_ref[...].astype(jnp.float32)   # f32
        mu = jnp.mean(y, axis=-1, keepdims=True)
        var = jnp.mean((y - mu) ** 2, axis=-1, keepdims=True)
        yn = (y - mu) * jax.lax.rsqrt(var + eps)                          # EUP rsqrt
        o_ref[...] = (yn * g_ref[...] + bb_ref[...]).astype(o_ref.dtype)


def linear_res_ln(x, w, b, res, gamma, beta, eps=1e-5,
                  out_dtype=jnp.bfloat16, tm_t=256, tk_t=1024):
    M, K = x.shape
    _, N = w.shape                      # N == hidden dim (LN axis un-tiled)
    tm = _tile(M, tm_t, 8)
    tk = _tile(K, tk_t, 128)
    grid = (M // tm, K // tk)
    cost = pl.CostEstimate(
        flops=2 * M * N * K + 10 * M * N,
        transcendentals=M,
        bytes_accessed=int(M * K * x.dtype.itemsize + K * N * w.dtype.itemsize
                           + 2 * M * N * 2))
    return pl.pallas_call(
        functools.partial(_linear_res_ln_kernel, eps=eps),
        out_shape=jax.ShapeDtypeStruct((M, N), out_dtype),
        grid=grid,
        in_specs=[pl.BlockSpec((tm, tk), lambda i, k: (i, k)),
                  pl.BlockSpec((tk, N), lambda i, k: (k, 0)),
                  pl.BlockSpec((1, N), lambda i, k: (0, 0)),
                  pl.BlockSpec((tm, N), lambda i, k: (i, 0)),
                  pl.BlockSpec((1, N), lambda i, k: (0, 0)),
                  pl.BlockSpec((1, N), lambda i, k: (0, 0))],
        out_specs=pl.BlockSpec((tm, N), lambda i, k: (i, 0)),
        scratch_shapes=[pltpu.VMEM((tm, N), jnp.float32)],
        compiler_params=pltpu.CompilerParams(
            dimension_semantics=("parallel", "arbitrary"),
            vmem_limit_bytes=VMEM_LIMIT),
        cost_estimate=cost,
    )(x, w, b.reshape(1, N), res, gamma.reshape(1, N), beta.reshape(1, N))


# ----------------------------------------------------------------------------
# Multi-head attention core.  Grid = (batch, q-tile, head-group); each block's
# last dim is G*head_dim (multiple of 128 where possible -> lane-dense loads &
# stores).  The mask->additive-bias conversion is hoisted out of the head
# loop; q is pre-scaled on the narrow (tq, gw) tile; softmax denominator uses
# the EUP reciprocal; each head's context is written straight into its o_ref
# lane slice (no concatenate).
# ----------------------------------------------------------------------------

def _mha_kernel(q_ref, k_ref, v_ref, m_ref, o_ref, *,
                heads_per_blk, head_dim, scale):
    hd = head_dim
    q = q_ref[0] * scale                 # (tq, G*hd) bf16, pre-scaled
    k = k_ref[0]                         # (Sk, G*hd) bf16
    v = v_ref[0]                         # (Sk, G*hd) bf16
    # additive mask bias, computed ONCE per grid step (shared by all heads)
    bias = jnp.where(m_ref[0] > 0.0, 0.0, -1e9).astype(jnp.float32)  # (mq, Sk)

    for h in range(heads_per_blk):
        qh = q[:, h * hd:(h + 1) * hd]
        kh = k[:, h * hd:(h + 1) * hd]
        vh = v[:, h * hd:(h + 1) * hd]
        # scores: (tq, Sk), contraction over head_dim, no materialized k.T
        s = jax.lax.dot_general(qh, kh, (((1,), (1,)), ((), ())),
                                preferred_element_type=jnp.float32)
        s = s + bias
        s = s - jnp.max(s, axis=-1, keepdims=True)
        p = jnp.exp(s)
        p = p * pl.reciprocal(jnp.sum(p, axis=-1, keepdims=True), approx=True)
        ctx = jnp.dot(p.astype(jnp.bfloat16), vh,
                      preferred_element_type=jnp.float32)        # (tq, hd)
        o_ref[0, :, h * hd:(h + 1) * hd] = ctx.astype(o_ref.dtype)


def mha(q, k, v, mask, n_heads):
    """q: (B, Sq, H), k/v: (B, Sk, H) bf16; mask: (B, mq, Sk), mq in {1, Sq},
       1.0 = keep, 0.0 = masked."""
    B, Sq, H = q.shape
    Sk = k.shape[1]
    hd = H // n_heads
    G = _head_group(n_heads, hd)         # heads per block (lane-dense blocks)
    n_hg = n_heads // G
    gw = G * hd                          # lane width of one head-group block
    tq = _tile(Sq, 256, 8)
    mq = mask.shape[1]

    if mq == 1:
        m_spec = pl.BlockSpec((1, 1, Sk), lambda b, qi, hg: (b, 0, 0))
    else:
        m_spec = pl.BlockSpec((1, tq, Sk), lambda b, qi, hg: (b, qi, 0))

    cost = pl.CostEstimate(
        flops=4 * B * Sq * Sk * H,
        transcendentals=B * n_heads * Sq * Sk,
        bytes_accessed=int((q.size + k.size + v.size) * 2
                           + mask.size * 2 + B * Sq * H * 2))
    kernel = functools.partial(_mha_kernel, heads_per_blk=G, head_dim=hd,
                               scale=1.0 / math.sqrt(hd))
    return pl.pallas_call(
        kernel,
        out_shape=jax.ShapeDtypeStruct((B, Sq, H), jnp.bfloat16),
        grid=(B, Sq // tq, n_hg),
        in_specs=[pl.BlockSpec((1, tq, gw), lambda b, qi, hg: (b, qi, hg)),
                  pl.BlockSpec((1, Sk, gw), lambda b, qi, hg: (b, 0, hg)),
                  pl.BlockSpec((1, Sk, gw), lambda b, qi, hg: (b, 0, hg)),
                  m_spec],
        out_specs=pl.BlockSpec((1, tq, gw), lambda b, qi, hg: (b, qi, hg)),
        compiler_params=pltpu.CompilerParams(
            dimension_semantics=("parallel", "parallel", "parallel"),
            vmem_limit_bytes=VMEM_LIMIT),
        cost_estimate=cost,
    )(q, k, v, mask.astype(jnp.bfloat16))


# ----------------------------------------------------------------------------
# DecoderLayer forward
# ----------------------------------------------------------------------------

def decoder_layer_fwd(trg, src, trg_mask, src_mask, p):
    B, St, H = trg.shape
    Ss = src.shape[1]
    nh = p["n_heads"]

    x = trg.reshape(B * St, H).astype(jnp.bfloat16)     # running bf16 activation
    src2 = src.reshape(B * Ss, H).astype(jnp.bfloat16)

    # --- 1) masked self-attention + residual + LN (shared ln params) ---------
    q, kk, vv = multi_linear(x, [p["sa_wq"], p["sa_wk"], p["sa_wv"]],
                             [p["sa_bq"], p["sa_bk"], p["sa_bv"]])
    ctx = mha(q.reshape(B, St, H), kk.reshape(B, St, H), vv.reshape(B, St, H),
              trg_mask, nh)                                        # (B,St,H) bf16
    x = linear_res_ln(ctx.reshape(B * St, H), p["sa_wo"], p["sa_bo"],
                      x, p["ln_g"], p["ln_b"])

    # --- 2) encoder (cross) attention + residual + LN ------------------------
    q = linear(x, p["ea_wq"], p["ea_bq"])
    kk, vv = multi_linear(src2, [p["ea_wk"], p["ea_wv"]],
                          [p["ea_bk"], p["ea_bv"]])
    ctx = mha(q.reshape(B, St, H), kk.reshape(B, Ss, H), vv.reshape(B, Ss, H),
              src_mask, nh)
    x = linear_res_ln(ctx.reshape(B * St, H), p["ea_wo"], p["ea_bo"],
                      x, p["ln_g"], p["ln_b"])

    # --- 3) position-wise feed-forward + residual + LN -----------------------
    h1 = linear(x, p["pf_w1"], p["pf_b1"], activation="relu")       # (M, pf) bf16
    x = linear_res_ln(h1, p["pf_w2"], p["pf_b2"], x, p["ln_g"], p["ln_b"],
                      out_dtype=jnp.float32)

    return x.reshape(B, St, H)


# ----------------------------------------------------------------------------
# Deterministic parameter init (weights bf16 for the MXU, biases / LN f32)
# ----------------------------------------------------------------------------

def init_params(key, hid_dim, n_heads, pf_dim):
    keys = jax.random.split(key, 10)
    ki = iter(keys)

    def w(k, shape, scale=0.02):
        return (jax.random.normal(k, shape, dtype=jnp.float32) * scale
                ).astype(jnp.bfloat16)

    H, P = hid_dim, pf_dim
    zb = lambda n: jnp.zeros((n,), jnp.float32)
    return {
        "n_heads": n_heads,
        # self-attention projections
        "sa_wq": w(next(ki), (H, H)), "sa_bq": zb(H),
        "sa_wk": w(next(ki), (H, H)), "sa_bk": zb(H),
        "sa_wv": w(next(ki), (H, H)), "sa_bv": zb(H),
        "sa_wo": w(next(ki), (H, H)), "sa_bo": zb(H),
        # encoder (cross) attention projections
        "ea_wq": w(next(ki), (H, H)), "ea_bq": zb(H),
        "ea_wk": w(next(ki), (H, H)), "ea_bk": zb(H),
        "ea_wv": w(next(ki), (H, H)), "ea_bv": zb(H),
        "ea_wo": w(next(ki), (H, H)), "ea_bo": zb(H),
        # position-wise feed-forward
        "pf_w1": w(next(ki), (H, P)), "pf_b1": zb(P),
        "pf_w2": w(next(ki), (P, H)), "pf_b2": zb(H),
        # single shared LayerNorm (matches self.ln in the PyTorch module)
        "ln_g": jnp.ones((H,), jnp.float32), "ln_b": zb(H),
    }


if __name__ == "__main__":
    B, ST, SS = 2, 8, 10
    HID, N_HEADS, PF_DIM = 128, 4, 256      # hd = 32, head-group = 4 heads (128 lanes)

    key = jax.random.PRNGKey(0)
    pkey, tkey, skey = jax.random.split(key, 3)
    params = init_params(pkey, HID, N_HEADS, PF_DIM)

    trg = jax.random.normal(tkey, (B, ST, HID), dtype=jnp.float32)
    src = jax.random.normal(skey, (B, SS, HID), dtype=jnp.float32)

    # target mask: causal AND key-padding (last 2 trg positions of batch 0 padded)
    trg_pad = jnp.ones((B, ST), jnp.float32).at[0, -2:].set(0.0)
    causal = jnp.tril(jnp.ones((ST, ST), jnp.float32))
    trg_mask = causal[None, :, :] * trg_pad[:, None, :]          # (B, ST, ST)
    # source mask: key-padding only (last 3 src positions of batch 0 padded)
    src_pad = jnp.ones((B, SS), jnp.float32).at[0, -3:].set(0.0)
    src_mask = src_pad[:, None, :]                               # (B, 1, SS)

    out = decoder_layer_fwd(trg, src, trg_mask, src_mask, params)
    jax.block_until_ready(out)
    assert out.shape == (B, ST, HID)
    assert bool(jnp.all(jnp.isfinite(out)))
    print("KERNEL_OK")
</pallas_src>

<mosaic_0001>
module attributes {stable_mosaic.version = 11 : i64} {
  func.func @_multi_linear_kernel(%arg0: i32, %arg1: i32, %arg2: memref<16x128xbf16, #tpu.memory_space<vmem>>, %arg3: memref<128x128xbf16, #tpu.memory_space<vmem>>, %arg4: memref<128x128xbf16, #tpu.memory_space<vmem>>, %arg5: memref<128x128xbf16, #tpu.memory_space<vmem>>, %arg6: memref<1x128xf32, #tpu.memory_space<vmem>>, %arg7: memref<1x128xf32, #tpu.memory_space<vmem>>, %arg8: memref<1x128xf32, #tpu.memory_space<vmem>>, %arg9: memref<16x128xbf16, #tpu.memory_space<vmem>>, %arg10: memref<16x128xbf16, #tpu.memory_space<vmem>>, %arg11: memref<16x128xbf16, #tpu.memory_space<vmem>>, %arg12: memref<16x128xf32, #tpu.memory_space<vmem>>, %arg13: memref<16x128xf32, #tpu.memory_space<vmem>>, %arg14: memref<16x128xf32, #tpu.memory_space<vmem>>) attributes {dimension_semantics = [#tpu.dimension_semantics<parallel>, #tpu.dimension_semantics<arbitrary>], iteration_bounds = array<i64: 1, 1>, scalar_prefetch = 0 : i64, scratch_operands = 3 : i64, tpu.core_type = #tpu.core_type<tc>, window_params = [{transform_indices = @transform_0, window_bounds = array<i64: 16, 128>}, {transform_indices = @transform_1, window_bounds = array<i64: 128, 128>}, {transform_indices = @transform_2, window_bounds = array<i64: 128, 128>}, {transform_indices = @transform_3, window_bounds = array<i64: 128, 128>}, {pipeline_mode = #tpu.pipeline_mode<synchronous>, transform_indices = @transform_4, window_bounds = array<i64: 1, 128>}, {pipeline_mode = #tpu.pipeline_mode<synchronous>, transform_indices = @transform_5, window_bounds = array<i64: 1, 128>}, {pipeline_mode = #tpu.pipeline_mode<synchronous>, transform_indices = @transform_6, window_bounds = array<i64: 1, 128>}, {transform_indices = @transform_7, window_bounds = array<i64: 16, 128>}, {transform_indices = @transform_8, window_bounds = array<i64: 16, 128>}, {transform_indices = @transform_9, window_bounds = array<i64: 16, 128>}]} {
    %c0_i32 = arith.constant 0 : i32
    %0 = arith.cmpi eq, %arg1, %c0_i32 : i32
    %1 = arith.extui %0 : i1 to i32
    %c0_i32_0 = arith.constant 0 : i32
    %2 = arith.cmpi ne, %1, %c0_i32_0 : i32
    scf.if %2 {
      %cst_24 = arith.constant 0.000000e+00 : f32
      %22 = vector.broadcast %cst_24 : f32 to vector<16x128xf32>
      %c0_25 = arith.constant 0 : index
      %c0_26 = arith.constant 0 : index
      %23 = vector.load %arg12[%c0_25, %c0_26] : memref<16x128xf32, #tpu.memory_space<vmem>>, vector<16x128xf32>
      tpu.vector_store %arg12[%c0_25, %c0_26], %22 {strides = array<i32>} : memref<16x128xf32, #tpu.memory_space<vmem>>, vector<16x128xf32>,
      %cst_27 = arith.constant 0.000000e+00 : f32
      %24 = vector.broadcast %cst_27 : f32 to vector<16x128xf32>
      %c0_28 = arith.constant 0 : index
      %c0_29 = arith.constant 0 : index
      %25 = vector.load %arg13[%c0_28, %c0_29] : memref<16x128xf32, #tpu.memory_space<vmem>>, vector<16x128xf32>
      tpu.vector_store %arg13[%c0_28, %c0_29], %24 {strides = array<i32>} : memref<16x128xf32, #tpu.memory_space<vmem>>, vector<16x128xf32>,
      %cst_30 = arith.constant 0.000000e+00 : f32
      %26 = vector.broadcast %cst_30 : f32 to vector<16x128xf32>
      %c0_31 = arith.constant 0 : index
      %c0_32 = arith.constant 0 : index
      %27 = vector.load %arg14[%c0_31, %c0_32] : memref<16x128xf32, #tpu.memory_space<vmem>>, vector<16x128xf32>
      tpu.vector_store %arg14[%c0_31, %c0_32], %26 {strides = array<i32>} : memref<16x128xf32, #tpu.memory_space<vmem>>, vector<16x128xf32>,
    } else {
    }
    %c0 = arith.constant 0 : index
    %c0_1 = arith.constant 0 : index
    %3 = vector.load %arg2[%c0, %c0_1] : memref<16x128xbf16, #tpu.memory_space<vmem>>, vector<16x128xbf16>
    %c0_2 = arith.constant 0 : index
    %c0_3 = arith.constant 0 : index
    %4 = vector.load %arg12[%c0_2, %c0_3] : memref<16x128xf32, #tpu.memory_space<vmem>>, vector<16x128xf32>
    %c0_4 = arith.constant 0 : index
    %c0_5 = arith.constant 0 : index
    %5 = vector.load %arg3[%c0_4, %c0_5] : memref<128x128xbf16, #tpu.memory_space<vmem>>, vector<128x128xbf16>
    %cst = arith.constant dense<0.000000e+00> : vector<16x128xf32>
    %6 = tpu.matmul %3, %5, %cst {dimension_numbers = #tpu.dot_dimension_numbers<[1], [0], [0], [1], [0, 0, 1, 1], [], []>} : vector<16x128xbf16>, vector<128x128xbf16>, vector<16x128xf32> -> vector<16x128xf32>
    %7 = arith.addf %4, %6 : vector<16x128xf32>
    %c0_6 = arith.constant 0 : index
    %c0_7 = arith.constant 0 : index
    %8 = vector.load %arg12[%c0_6, %c0_7] : memref<16x128xf32, #tpu.memory_space<vmem>>, vector<16x128xf32>
    tpu.vector_store %arg12[%c0_6, %c0_7], %7 {strides = array<i32>} : memref<16x128xf32, #tpu.memory_space<vmem>>, vector<16x128xf32>,
    %c0_8 = arith.constant 0 : index
    %c0_9 = arith.constant 0 : index
    %9 = vector.load %arg13[%c0_8, %c0_9] : memref<16x128xf32, #tpu.memory_space<vmem>>, vector<16x128xf32>
    %c0_10 = arith.constant 0 : index
    %c0_11 = arith.constant 0 : index
    %10 = vector.load %arg4[%c0_10, %c0_11] : memref<128x128xbf16, #tpu.memory_space<vmem>>, vector<128x128xbf16>
    %cst_12 = arith.constant dense<0.000000e+00> : vector<16x128xf32>
    %11 = tpu.matmul %3, %10, %cst_12 {dimension_numbers = #tpu.dot_dimension_numbers<[1], [0], [0], [1], [0, 0, 1, 1], [], []>} : vector<16x128xbf16>, vector<128x128xbf16>, vector<16x128xf32> -> vector<16x128xf32>
    %12 = arith.addf %9, %11 : vector<16x128xf32>
    %c0_13 = arith.constant 0 : index
    %c0_14 = arith.constant 0 : index
    %13 = vector.load %arg13[%c0_13, %c0_14] : memref<16x128xf32, #tpu.memory_space<vmem>>, vector<16x128xf32>
    tpu.vector_store %arg13[%c0_13, %c0_14], %12 {strides = array<i32>} : memref<16x128xf32, #tpu.memory_space<vmem>>, vector<16x128xf32>,
    %c0_15 = arith.constant 0 : index
    %c0_16 = arith.constant 0 : index
    %14 = vector.load %arg14[%c0_15, %c0_16] : memref<16x128xf32, #tpu.memory_space<vmem>>, vector<16x128xf32>
    %c0_17 = arith.constant 0 : index
    %c0_18 = arith.constant 0 : index
    %15 = vector.load %arg5[%c0_17, %c0_18] : memref<128x128xbf16, #tpu.memory_space<vmem>>, vector<128x128xbf16>
    %cst_19 = arith.constant dense<0.000000e+00> : vector<16x128xf32>
    %16 = tpu.matmul %3, %15, %cst_19 {dimension_numbers = #tpu.dot_dimension_numbers<[1], [0], [0], [1], [0, 0, 1, 1], [], []>} : vector<16x128xbf16>, vector<128x128xbf16>, vector<16x128xf32> -> vector<16x128xf32>
    %17 = arith.addf %14, %16 : vector<16x128xf32>
    %c0_20 = arith.constant 0 : index
    %c0_21 = arith.constant 0 : index
    %18 = vector.load %arg14[%c0_20, %c0_21] : memref<16x128xf32, #tpu.memory_space<vmem>>, vector<16x128xf32>
    tpu.vector_store %arg14[%c0_20, %c0_21], %17 {strides = array<i32>} : memref<16x128xf32, #tpu.memory_space<vmem>>, vector<16x128xf32>,
    %c0_i32_22 = arith.constant 0 : i32
    %19 = arith.cmpi eq, %arg1, %c0_i32_22 : i32
    %20 = arith.extui %19 : i1 to i32
    %c0_i32_23 = arith.constant 0 : i32
    %21 = arith.cmpi ne, %20, %c0_i32_23 : i32
    scf.if %21 {
      %c0_24 = arith.constant 0 : index
      %c0_25 = arith.constant 0 : index
      %22 = vector.load %arg12[%c0_24, %c0_25] : memref<16x128xf32, #tpu.memory_space<vmem>>, vector<16x128xf32>
      %c0_26 = arith.constant 0 : index
      %c0_27 = arith.constant 0 : index
      %23 = vector.load %arg6[%c0_26, %c0_27] : memref<1x128xf32, #tpu.memory_space<vmem>>, vector<1x128xf32>
      %24 = vector.broadcast %23 : vector<1x128xf32> to vector<16x128xf32>
      %25 = arith.addf %22, %24 : vector<16x128xf32>
      %26 = arith.truncf %25 : vector<16x128xf32> to vector<16x128xbf16>
      %c0_28 = arith.constant 0 : index
      %c0_29 = arith.constant 0 : index
      %27 = vector.load %arg9[%c0_28, %c0_29] : memref<16x128xbf16, #tpu.memory_space<vmem>>, vector<16x128xbf16>
      tpu.vector_store %arg9[%c0_28, %c0_29], %26 {strides = array<i32>} : memref<16x128xbf16, #tpu.memory_space<vmem>>, vector<16x128xbf16>,
      %c0_30 = arith.constant 0 : index
      %c0_31 = arith.constant 0 : index
      %28 = vector.load %arg13[%c0_30, %c0_31] : memref<16x128xf32, #tpu.memory_space<vmem>>, vector<16x128xf32>
      %c0_32 = arith.constant 0 : index
      %c0_33 = arith.constant 0 : index
      %29 = vector.load %arg7[%c0_32, %c0_33] : memref<1x128xf32, #tpu.memory_space<vmem>>, vector<1x128xf32>
      %30 = vector.broadcast %29 : vector<1x128xf32> to vector<16x128xf32>
      %31 = arith.addf %28, %30 : vector<16x128xf32>
      %32 = arith.truncf %31 : vector<16x128xf32> to vector<16x128xbf16>
      %c0_34 = arith.constant 0 : index
      %c0_35 = arith.constant 0 : index
      %33 = vector.load %arg10[%c0_34, %c0_35] : memref<16x128xbf16, #tpu.memory_space<vmem>>, vector<16x128xbf16>
      tpu.vector_store %arg10[%c0_34, %c0_35], %32 {strides = array<i32>} : memref<16x128xbf16, #tpu.memory_space<vmem>>, vector<16x128xbf16>,
      %c0_36 = arith.constant 0 : index
      %c0_37 = arith.constant 0 : index
      %34 = vector.load %arg14[%c0_36, %c0_37] : memref<16x128xf32, #tpu.memory_space<vmem>>, vector<16x128xf32>
      %c0_38 = arith.constant 0 : index
      %c0_39 = arith.constant 0 : index
      %35 = vector.load %arg8[%c0_38, %c0_39] : memref<1x128xf32, #tpu.memory_space<vmem>>, vector<1x128xf32>
      %36 = vector.broadcast %35 : vector<1x128xf32> to vector<16x128xf32>
      %37 = arith.addf %34, %36 : vector<16x128xf32>
      %38 = arith.truncf %37 : vector<16x128xf32> to vector<16x128xbf16>
      %c0_40 = arith.constant 0 : index
      %c0_41 = arith.constant 0 : index
      %39 = vector.load %arg11[%c0_40, %c0_41] : memref<16x128xbf16, #tpu.memory_space<vmem>>, vector<16x128xbf16>
      tpu.vector_store %arg11[%c0_40, %c0_41], %38 {strides = array<i32>} : memref<16x128xbf16, #tpu.memory_space<vmem>>, vector<16x128xbf16>,
    } else {
    }
    return
  }
  func.func @transform_0(%arg0: i32, %arg1: i32) -> (i32, i32) {
    %c0_i32 = arith.constant 0 : i32
    return %arg0, %arg1 : i32, i32
  }
  func.func @transform_1(%arg0: i32, %arg1: i32) -> (i32, i32) {
    %c0_i32 = arith.constant 0 : i32
    %c0_i32_0 = arith.constant 0 : i32
    return %arg1, %c0_i32 : i32, i32
  }
  func.func @transform_2(%arg0: i32, %arg1: i32) -> (i32, i32) {
    %c0_i32 = arith.constant 0 : i32
    %c0_i32_0 = arith.constant 0 : i32
    return %arg1, %c0_i32 : i32, i32
  }
  func.func @transform_3(%arg0: i32, %arg1: i32) -> (i32, i32) {
    %c0_i32 = arith.constant 0 : i32
    %c0_i32_0 = arith.constant 0 : i32
    return %arg1, %c0_i32 : i32, i32
  }
  func.func @transform_4(%arg0: i32, %arg1: i32) -> (i32, i32) {
    %c0_i32 = arith.constant 0 : i32
    %c0_i32_0 = arith.constant 0 : i32
    %c0_i32_1 = arith.constant 0 : i32
    return %c0_i32, %c0_i32_0 : i32, i32
  }
  func.func @transform_5(%arg0: i32, %arg1: i32) -> (i32, i32) {
    %c0_i32 = arith.constant 0 : i32
    %c0_i32_0 = arith.constant 0 : i32
    %c0_i32_1 = arith.constant 0 : i32
    return %c0_i32, %c0_i32_0 : i32, i32
  }
  func.func @transform_6(%arg0: i32, %arg1: i32) -> (i32, i32) {
    %c0_i32 = arith.constant 0 : i32
    %c0_i32_0 = arith.constant 0 : i32
    %c0_i32_1 = arith.constant 0 : i32
    return %c0_i32, %c0_i32_0 : i32, i32
  }
  func.func @transform_7(%arg0: i32, %arg1: i32) -> (i32, i32) {
    %c0_i32 = arith.constant 0 : i32
    %c0_i32_0 = arith.constant 0 : i32
    return %arg0, %c0_i32 : i32, i32
  }
  func.func @transform_8(%arg0: i32, %arg1: i32) -> (i32, i32) {
    %c0_i32 = arith.constant 0 : i32
    %c0_i32_0 = arith.constant 0 : i32
    return %arg0, %c0_i32 : i32, i32
  }
  func.func @transform_9(%arg0: i32, %arg1: i32) -> (i32, i32) {
    %c0_i32 = arith.constant 0 : i32
    %c0_i32_0 = arith.constant 0 : i32
    return %arg0, %c0_i32 : i32, i32
  }
}

</mosaic_0001>

<bundles_post_ra>
// kernel: tpu_custom_call.1
= control target key start
LH: loop header
LB: loop body
LE: loop exit
PB: predicated region body
PF: predicated region fallthrough
CT: control target
= control target key end

     0   :  { %15 = vsyncpa [#allocation6], 0  ;;  %s1115_s0 = inlined_call_operand.hbm [shape: bf16[16,128], index: 0, kind: input, shape index: {}]   ;;  %s1116_s1 = inlined_call_operand.hbm [shape: bf16[128,128], index: 1, kind: input, shape index: {}]   ;;  %s1117_s2 = inlined_call_operand.hbm [shape: bf16[128,128], index: 2, kind: input, shape index: {}]   ;;  %s1118_s3 = inlined_call_operand.hbm [shape: bf16[128,128], index: 3, kind: input, shape index: {}]   ;;  %s1119_s4 = inlined_call_operand.vmem [shape: f32[1,128], index: 4, kind: input, shape index: {}]   ;;  %s1120_s5 = inlined_call_operand.vmem [shape: f32[1,128], index: 5, kind: input, shape index: {}]   ;;  %s1121_s6 = inlined_call_operand.vmem [shape: f32[1,128], index: 6, kind: input, shape index: {}]   ;;  %s1122_s7 = inlined_call_operand.hbm [shape: bf16[16,128], index: 7, kind: output, shape index: {0}]   ;;  %s1123_s8 = inlined_call_operand.hbm [shape: bf16[16,128], index: 8, kind: output, shape index: {1}]   ;;  %s1124_s9 = inlined_call_operand.hbm [shape: bf16[16,128], index: 9, kind: output, shape index: {2}]  }
   0x1   :  { %16 = vsyncpa [#allocation9], 0 }
   0x2   :  { %17 = vsyncpa [#allocation12], 0 }
   0x3   :  { %18 = vsyncpa [#allocation7], 0 }
   0x4   :  { %19 = vsyncpa [#allocation15], 0  ;;  %s896_s30 = smov [#allocation8]   ;;  %s897_s11 = smov [#allocation5]  }
   0x5   :  { %s37_s10 = sshll.u32 %s896_s30, 4  ;;  %s25_s12 = sshll.u32 %s897_s11, 4  ;;  %s38_s10 = int_to_ptr.vmem [resolvable:$true] %s37_s10  ;;  %s957_s12 = int_to_ptr.vmem [resolvable:$true] %s25_s12 }
   0x6   :  { %s732_s15 = scalar_lea.hbm %s1116_s1, 1024 }
   0x7   :  { %p733_p0 = scmp.ne.s32.totalorder %s1116_s1, %s732_s15  ;;  %p736_p1 = scmp.lt.u32.totalorder %s732_s15, %s1116_s1 }
   0x9   :  { %p738_p2 = pnand %p736_p1, %p733_p0 }
   0xb   :  { %741 = shalt.err (!%p738_p2)
}
   0xc   :  { %s742_s20 = scalar_lea.vmem %s38_s10, 1024  ;;  %p747_p4 = scmp.lt.s32.totalorder %s38_s10, %s38_s10 }
   0xd   :  { %p743_p3 = scmp.ne.s32.totalorder %s38_s10, %s742_s20  ;;  %p748_p5 = scmp.lt.s32.totalorder %s742_s20, %s742_s20 }
   0xf   :  { %p749_p6 = por %p748_p5, %p747_p4 }
  0x11   :  { %p750_p7 = pnand %p749_p6, %p743_p3 }
  0x13   :  { %753 = shalt.err (!%p750_p7)
}
  0x14   :  { %s898_s21 = smov 64   ;;  %s899_s22 = smov 4  }
  0x15   :  { %43 = dma.hbm_to_vmem [thread:$0]  %s1116_s1, 1024, %s38_s10, [#allocation9], %s898_s21, %s898_s21, %s899_s22  }
  0x16   :  { %s754_s27 = scalar_lea.hbm %s1115_s0, 128 }
  0x17   :  { %p755_p8 = scmp.ne.s32.totalorder %s1115_s0, %s754_s27  ;;  %p758_p9 = scmp.lt.u32.totalorder %s754_s27, %s1115_s0 }
  0x19   :  { %p760_p10 = pnand %p758_p9, %p755_p8 }
  0x1b   :  { %763 = shalt.err (!%p760_p10)
}
  0x1c   :  { %s764_s13 = scalar_lea.vmem %s957_s12, 128  ;;  %p769_p12 = scmp.lt.s32.totalorder %s957_s12, %s957_s12 }
  0x1d   :  { %p765_p11 = scmp.ne.s32.totalorder %s957_s12, %s764_s13  ;;  %p770_p13 = scmp.lt.s32.totalorder %s764_s13, %s764_s13 }
  0x1f   :  { %p771_p0 = por %p770_p13, %p769_p12 }
  0x21   :  { %p772_p1 = pnand %p771_p0, %p765_p11 }
  0x23   :  { %775 = shalt.err (!%p772_p1)
}
  0x24   :  { %31 = dma.hbm_to_vmem [thread:$0]  %s1115_s0, 128, %s957_s12, [#allocation6], %s898_s21, %s898_s21, %s899_s22  }
  0x25   :  { %s900_s14 = smov [#allocation10]   ;;  %s901_s16 = smov [#allocation11]  }
  0x26   :  { %s49_s15 = sshll.u32 %s900_s14, 4  ;;  %s61_s17 = sshll.u32 %s901_s16, 4  ;;  %s50_s15 = int_to_ptr.vmem [resolvable:$true] %s49_s15  ;;  %s994_s17 = int_to_ptr.vmem [resolvable:$true] %s61_s17 }
  0x27   :  { %s776_s20 = scalar_lea.hbm %s1117_s2, 1024 }
  0x28   :  { %p777_p2 = scmp.ne.s32.totalorder %s1117_s2, %s776_s20  ;;  %p780_p3 = scmp.lt.u32.totalorder %s776_s20, %s1117_s2 }
  0x2a   :  { %p782_p4 = pnand %p780_p3, %p777_p2 }
  0x2c   :  { %785 = shalt.err (!%p782_p4)
}
  0x2d   :  { %s786_s0 = scalar_lea.vmem %s50_s15, 1024  ;;  %p791_p6 = scmp.lt.s32.totalorder %s50_s15, %s50_s15 }
  0x2e   :  { %p787_p5 = scmp.ne.s32.totalorder %s50_s15, %s786_s0  ;;  %p792_p7 = scmp.lt.s32.totalorder %s786_s0, %s786_s0 }
  0x30   :  { %p793_p8 = por %p792_p7, %p791_p6 }
  0x32   :  { %p794_p9 = pnand %p793_p8, %p787_p5 }
  0x34   :  { %797 = shalt.err (!%p794_p9)
}
  0x35   :  { %55 = dma.hbm_to_vmem [thread:$0]  %s1117_s2, 1024, %s50_s15, [#allocation9], %s898_s21, %s898_s21, %s899_s22  }
  0x36   :  { %s798_s30 = scalar_lea.hbm %s1118_s3, 1024 }
  0x37   :  { %p799_p10 = scmp.ne.s32.totalorder %s1118_s3, %s798_s30  ;;  %p802_p11 = scmp.lt.u32.totalorder %s798_s30, %s1118_s3 }
  0x39   :  { %p804_p12 = pnand %p802_p11, %p799_p10 }
  0x3b   :  { %807 = shalt.err (!%p804_p12)
}
  0x3c   :  { %s808_s14 = scalar_lea.vmem %s994_s17, 1024  ;;  %p813_p0 = scmp.lt.s32.totalorder %s994_s17, %s994_s17 }
  0x3d   :  { %p809_p13 = scmp.ne.s32.totalorder %s994_s17, %s808_s14  ;;  %p814_p1 = scmp.lt.s32.totalorder %s808_s14, %s808_s14 }
  0x3f   :  { %p815_p2 = por %p814_p1, %p813_p0 }
  0x41   :  { %p816_p3 = pnand %p815_p2, %p809_p13 }
  0x43   :  { %819 = shalt.err (!%p816_p3)
}
  0x44   :  { %67 = dma.hbm_to_vmem [thread:$0]  %s1118_s3, 1024, %s994_s17, [#allocation12], %s898_s21, %s898_s21, %s899_s22  }
  0x45   :  { %886 = dma.done.wait [#allocation6], 128  }
  0x46   :  { %887 = vsyncadd [#allocation6], 4294967168 }
  0x47   :  { %888 = dma.done.wait [#allocation9], 2048  }
  0x48   :  { %889 = vsyncadd [#allocation9], 4294965248 }
  0x49   :  { %890 = dma.done.wait [#allocation12], 1024  }
  0x4a   :  { %891 = vsyncadd [#allocation12], 4294966272  ;;  %v902_v0 = vmov 0.0   ;;  %vm903_vm0 = vmmov 0   ;;  %v707_v1 = vld [vmem:[#allocation8] sm:$0xff]   ;;  %v708_v2 = vld [vmem:[#allocation8 + $0x8] sm:$0xff]  }
  0x4b   :  { %636 = vmatprep.subr.bf16.mxu0 %v902_v0  ;;  %656 = vmatprep.subr.bf16.mxu1 %v902_v0  ;;  %v709_v3 = vld [vmem:[#allocation8 + $0x10] sm:$0xff]   ;;  %v715_v4 = vld [vmem:[#allocation10] sm:$0xff]   ;;  %v710_v5 = vld [vmem:[#allocation8 + $0x18] sm:$0xff]   ;;  %s904_s17 = smov [#allocation13]  }
  0x4c   :  { %652 = vmatprep.mubr.msk.bf16.mxu0 %vm903_vm0, %v902_v0  ;;  %672 = vmatprep.mubr.msk.bf16.mxu1 %vm903_vm0, %v902_v0  ;;  %v717_v6 = vld [vmem:[#allocation10 + $0x8] sm:$0xff]   ;;  %v711_v7 = vld [vmem:[#allocation8 + $0x20] sm:$0xff]   ;;  %v719_v8 = vld [vmem:[#allocation10 + $0x10] sm:$0xff]   ;;  %s509_s18 = sshll.u32 %s904_s17, 4  ;;  %s510_s18 = int_to_ptr.vmem [resolvable:$true] %s509_s18 }
  0x4d   :  { %637 = vmatpush3.bf16.msra.mxu0 %v707_v1  ;;  %657 = vmatpush3.bf16.msra.mxu1 %v715_v4  ;;  %v712_v9 = vld [vmem:[#allocation8 + $0x28] sm:$0xff]   ;;  %v721_v10 = vld [vmem:[#allocation10 + $0x18] sm:$0xff]   ;;  %v713_v11 = vld [vmem:[#allocation8 + $0x30] sm:$0xff]   ;;  %s820_s23 = scalar_lea.vmem %s510_s18, 128  ;;  %p825_p5 = scmp.lt.s32.totalorder %s510_s18, %s510_s18 }
  0x4e   :  { %638 = vmatprep.subr.bf16.mxu0 %v902_v0  ;;  %658 = vmatprep.subr.bf16.mxu1 %v902_v0  ;;  %v723_v12 = vld [vmem:[#allocation10 + $0x20] sm:$0xff]   ;;  %v714_v13 = vld [vmem:[#allocation8 + $0x38] sm:$0xff]   ;;  %v725_v14 = vld [vmem:[#allocation10 + $0x28] sm:$0xff]   ;;  %p821_p4 = scmp.ne.s32.totalorder %s510_s18, %s820_s23  ;;  %p826_p6 = scmp.lt.s32.totalorder %s820_s23, %s820_s23 }
  0x4f   :  { %v716_v15 = vld [vmem:[#allocation5] sm:$0xff]   ;;  %v718_v16 = vld [vmem:[#allocation11] sm:$0xff]   ;;  %v727_v17 = vld [vmem:[#allocation10 + $0x30] sm:$0xff]  }
  0x50   :  { %v720_v18 = vld [vmem:[#allocation11 + $0x8] sm:$0xff]   ;;  %v729_v19 = vld [vmem:[#allocation10 + $0x38] sm:$0xff]   ;;  %v722_v20 = vld [vmem:[#allocation11 + $0x10] sm:$0xff]   ;;  %p827_p7 = por %p826_p6, %p825_p5 }
  0x51   :  { %639 = vmatpush3.bf16.msra.mxu0 %v708_v2  ;;  %659 = vmatpush3.bf16.msra.mxu1 %v717_v6  ;;  %v724_v21 = vld [vmem:[#allocation11 + $0x18] sm:$0xff]   ;;  %v726_v22 = vld [vmem:[#allocation11 + $0x20] sm:$0xff]   ;;  %v728_v23 = vld [vmem:[#allocation11 + $0x28] sm:$0xff]  }
  0x52   :  { %640 = vmatprep.subr.bf16.mxu0 %v902_v0  ;;  %660 = vmatprep.subr.bf16.mxu1 %v902_v0  ;;  %v730_v24 = vld [vmem:[#allocation11 + $0x30] sm:$0xff]   ;;  %v731_v25 = vld [vmem:[#allocation11 + $0x38] sm:$0xff]   ;;  %p828_p8 = pnand %p827_p7, %p821_p4 }
  0x53   :  { %v579_v26 = vld [vmem:[%s1119_s4] ss:$0 sm:$0xff] }
  0x54   :  { %v582_v34 = vld [vmem:[%s1120_s5] ss:$0 sm:$0xff] }
  0x55   :  { %641 = vmatpush3.bf16.msra.mxu0 %v709_v3  ;;  %661 = vmatpush3.bf16.msra.mxu1 %v719_v8 }
  0x56   :  { %642 = vmatprep.subr.bf16.mxu0 %v902_v0  ;;  %662 = vmatprep.subr.bf16.mxu1 %v902_v0 }
  0x59   :  { %643 = vmatpush3.bf16.msra.mxu0 %v710_v5  ;;  %663 = vmatpush3.bf16.msra.mxu1 %v721_v10 }
  0x5a   :  { %644 = vmatprep.subr.bf16.mxu0 %v902_v0  ;;  %664 = vmatprep.subr.bf16.mxu1 %v902_v0 }
  0x5d   :  { %645 = vmatpush3.bf16.msra.mxu0 %v711_v7  ;;  %665 = vmatpush3.bf16.msra.mxu1 %v723_v12 }
  0x5e   :  { %646 = vmatprep.subr.bf16.mxu0 %v902_v0  ;;  %666 = vmatprep.subr.bf16.mxu1 %v902_v0 }
  0x61   :  { %647 = vmatpush3.bf16.msra.mxu0 %v712_v9  ;;  %667 = vmatpush3.bf16.msra.mxu1 %v725_v14 }
  0x62   :  { %648 = vmatprep.subr.bf16.mxu0 %v902_v0  ;;  %668 = vmatprep.subr.bf16.mxu1 %v902_v0 }
  0x65   :  { %649 = vmatpush3.bf16.msra.mxu0 %v713_v11  ;;  %669 = vmatpush3.bf16.msra.mxu1 %v727_v17 }
  0x66   :  { %650 = vmatprep.subr.bf16.mxu0 %v902_v0  ;;  %670 = vmatprep.subr.bf16.mxu1 %v902_v0 }
  0x69   :  { %651 = vmatpush3.bf16.msra.mxu0 %v714_v13  ;;  %671 = vmatpush3.bf16.msra.mxu1 %v729_v19 }
  0x6a   :  { %676 = vmatprep.subr.bf16.mxu0 %v902_v0 }
  0x6c   :  { %653 = vmatmul.mubr.bf16.vlgmr.msra.gmra.mrb[0].mxu0 %v716_v15  ;;  %673 = vmatmul.mubr.bf16.vlgmr.msra.gmra.mrb[0].mxu1 %v716_v15 }
  0x6d   :  { %677 = vmatpush3.bf16.msra.mxu0 %v718_v16  ;;  %692 = vmatprep.mubr.msk.bf16.mxu0 %vm903_vm0, %v902_v0 }
  0x6e   :  { %678 = vmatprep.subr.bf16.mxu0 %v902_v0 }
  0x71   :  { %679 = vmatpush3.bf16.msra.mxu0 %v720_v18 }
  0x72   :  { %680 = vmatprep.subr.bf16.mxu0 %v902_v0 }
  0x75   :  { %681 = vmatpush3.bf16.msra.mxu0 %v722_v20 }
  0x76   :  { %682 = vmatprep.subr.bf16.mxu0 %v902_v0 }
  0x79   :  { %683 = vmatpush3.bf16.msra.mxu0 %v724_v21 }
  0x7a   :  { %684 = vmatprep.subr.bf16.mxu0 %v902_v0 }
  0x7d   :  { %685 = vmatpush3.bf16.msra.mxu0 %v726_v22 }
  0x7e   :  { %686 = vmatprep.subr.bf16.mxu0 %v902_v0 }
  0x81   :  { %687 = vmatpush3.bf16.msra.mxu0 %v728_v23 }
  0x82   :  { %688 = vmatprep.subr.bf16.mxu0 %v902_v0 }
  0x85   :  { %689 = vmatpush3.bf16.msra.mxu0 %v730_v24 }
  0x86   :  { %690 = vmatprep.subr.bf16.mxu0 %v902_v0 }
  0x89   :  { %691 = vmatpush3.bf16.msra.mxu0 %v731_v25 }
  0x8c   :  { %693 = vmatmul.mubr.bf16.vlgmr.msra.gmra.mrb[4].mxu0 %v716_v15 }
 0x13f   :  { %v205_v27 = vpop.f32.mrb[0].mxu0  ;;  %v316_v35 = vpop.f32.mrb[0].mxu1 }
 0x140   :  { %v450_v28 = vadd.f32 %v579_v26, %v205_v27  ;;  %v654_v29 = vpop.f32.mrb[1].mxu0 }
 0x141   :  { %v208_v30 = vpop.f32.mrb[2].mxu0 }
 0x142   :  { %v451_v31 = vadd.f32 %v579_v26, %v208_v30  ;;  %v655_v32 = vpop.f32.mrb[3].mxu0 }
 0x144   :  { %v597_v33 = vpack.c.bf16 %v451_v31, %v450_v28 }
 0x146   :  { %598 = vst [vmem:[#allocation13] sm:$0xff] %v597_v33  }
 0x147   :  { %831 = shalt.err (!%p828_p8)
}
 0x148   :  { %s832_s25 = scalar_lea.hbm %s1122_s7, 128 }
 0x149   :  { %p833_p9 = scmp.ne.s32.totalorder %s1122_s7, %s832_s25  ;;  %p836_p10 = scmp.lt.u32.totalorder %s832_s25, %s1122_s7 }
 0x14b   :  { %p838_p11 = pnand %p836_p10, %p833_p9 }
 0x14d   :  { %841 = shalt.err (!%p838_p11)
}
 0x14e   :  { %515 = dma.vmem_to_hbm [thread:$0]  %s510_s18, 128, %s1122_s7, [#allocation7], %s898_s21, %s898_s21, %s899_s22   ;;  %v471_v36 = vadd.f32 %v582_v34, %v316_v35  ;;  %v674_v37 = vpop.f32.mrb[1].mxu1 }
 0x14f   :  { %v319_v38 = vpop.f32.mrb[2].mxu1  ;;  %s905_s29 = smov [#allocation14]  }
 0x150   :  { %s521_s30 = sshll.u32 %s905_s29, 4  ;;  %v472_v39 = vadd.f32 %v582_v34, %v319_v38  ;;  %v675_v40 = vpop.f32.mrb[3].mxu1  ;;  %s522_s30 = int_to_ptr.vmem [resolvable:$true] %s521_s30 }
 0x151   :  { %s842_s11 = scalar_lea.vmem %s522_s30, 128  ;;  %p847_p13 = scmp.lt.s32.totalorder %s522_s30, %s522_s30 }
 0x152   :  { %v602_v41 = vpack.c.bf16 %v472_v39, %v471_v36  ;;  %p843_p12 = scmp.ne.s32.totalorder %s522_s30, %s842_s11  ;;  %p848_p0 = scmp.lt.s32.totalorder %s842_s11, %s842_s11 }
 0x154   :  { %603 = vst [vmem:[#allocation14] sm:$0xff] %v602_v41   ;;  %p849_p1 = por %p848_p0, %p847_p13 }
 0x156   :  { %p850_p2 = pnand %p849_p1, %p843_p12 }
 0x158   :  { %853 = shalt.err (!%p850_p2)
}
 0x159   :  { %s854_s7 = scalar_lea.hbm %s1123_s8, 128 }
 0x15a   :  { %p855_p3 = scmp.ne.s32.totalorder %s1123_s8, %s854_s7  ;;  %p858_p4 = scmp.lt.u32.totalorder %s854_s7, %s1123_s8 }
 0x15c   :  { %p860_p5 = pnand %p858_p4, %p855_p3 }
 0x15e   :  { %863 = shalt.err (!%p860_p5)
}
 0x15f   :  { %527 = dma.vmem_to_hbm [thread:$0]  %s522_s30, 128, %s1123_s8, [#allocation15], %s898_s21, %s898_s21, %s899_s22   ;;  %v427_v42 = vpop.f32.mrb[4].mxu0 }
 0x160   :  { %v585_v43 = vld [vmem:[%s1121_s6] ss:$0 sm:$0xff]  ;;  %v694_v44 = vpop.f32.mrb[5].mxu0  ;;  %s906_s19 = smov [#allocation16]  }
 0x161   :  { %v430_v45 = vpop.f32.mrb[6].mxu0  ;;  %s533_s20 = sshll.u32 %s906_s19, 4  ;;  %v492_v46 = vadd.f32 %v585_v43, %v427_v42  ;;  %s534_s20 = int_to_ptr.vmem [resolvable:$true] %s533_s20 }
 0x162   :  { %v493_v47 = vadd.f32 %v585_v43, %v430_v45  ;;  %v695_v48 = vpop.f32.mrb[7].mxu0  ;;  %s864_s23 = scalar_lea.vmem %s534_s20, 128  ;;  %p869_p7 = scmp.lt.s32.totalorder %s534_s20, %s534_s20 }
 0x163   :  { %p865_p6 = scmp.ne.s32.totalorder %s534_s20, %s864_s23  ;;  %p870_p8 = scmp.lt.s32.totalorder %s864_s23, %s864_s23 }
 0x164   :  { %v607_v49 = vpack.c.bf16 %v493_v47, %v492_v46 }
 0x165   :  { %p871_p9 = por %p870_p8, %p869_p7 }
 0x166   :  { %608 = vst [vmem:[#allocation16] sm:$0xff] %v607_v49  }
 0x167   :  { %p872_p10 = pnand %p871_p9, %p865_p6 }
 0x169   :  { %875 = shalt.err (!%p872_p10)
}
 0x16a   :  { %s876_s6 = scalar_lea.hbm %s1124_s9, 128 }
 0x16b   :  { %p877_p11 = scmp.ne.s32.totalorder %s1124_s9, %s876_s6  ;;  %p880_p12 = scmp.lt.u32.totalorder %s876_s6, %s1124_s9 }
 0x16d   :  { %p882_p13 = pnand %p880_p12, %p877_p11 }
 0x16f   :  { %885 = shalt.err (!%p882_p13)
}
 0x170   :  { %539 = dma.vmem_to_hbm [thread:$0]  %s534_s20, 128, %s1124_s9, [#allocation15], %s898_s21, %s898_s21, %s899_s22  }
 0x171   :  { %892 = dma.done.wait [#allocation7], 128  }
 0x172   :  { %893 = vsyncadd [#allocation7], 4294967168 }
 0x173   :  { %894 = dma.done.wait [#allocation15], 256  }
 0x174   :  { %895 = vsyncadd [#allocation15], 4294967040 }
 0x175   :  { %549 = vsyncpa [#allocation6], 1 }
 0x176   :  { %550 = vsyncpa [#allocation9], 1 }
 0x177   :  { %551 = vsyncpa [#allocation12], 1 }
 0x178   :  { %552 = vsyncpa [#allocation7], 1 }
 0x179   :  { %553 = vsyncpa [#allocation15], 1 }

</bundles_post_ra>
